<compile_context>
chip_gen: v6e
topology: v6e:2x2x1
jax: 0.10.0
libtpu: 0.0.40
codegen_flags: <defaults>
</compile_context>

<pallas_src>
import jax
import jax.numpy as jnp
from jax.experimental import pallas as pl
from jax.experimental.pallas import tpu as pltpu


def _cdiv(a, b):
    return -(-a // b)


def _round_up(a, m):
    return _cdiv(a, m) * m


def _vmem_capacity_bytes():
    try:
        return int(pltpu.get_tpu_info().vmem_capacity_bytes)
    except Exception:
        return 64 << 20            # conservative default: v7x per-TC VMEM


def _tensorcores_per_chip():
    try:
        info = pltpu.get_tpu_info()
        for name in ("num_tensorcores", "tensorcores_per_chip", "num_cores",
                     "core_count"):
            v = getattr(info, name, None)
            if v:
                return int(v)
    except Exception:
        pass
    try:
        return int(getattr(jax.devices()[0], "num_cores", 1) or 1)
    except Exception:
        return 1


def _feature_dropout_kernel(x_ref, idx_ref, noise_ref, o_ref):
    # x_ref    : (tr, F)      input rows (tail block may hang off the array end)
    # idx_ref  : (tr, 1)      int32 batch index per row
    # noise_ref: (B_pad, F)   per-batch-element feature mask, pre-scaled 1/(1-p)
    # o_ref    : (tr, F)      output rows
    tr = x_ref.shape[0]
    b_pad = noise_ref.shape[0]

    idx = idx_ref[...]                                              # (tr, 1)
    b_iota = jax.lax.broadcasted_iota(jnp.int32, (tr, b_pad), 1)    # (tr, B_pad)
    # Exact 0/1 one-hot, built in the noise dtype (bf16 stays bf16 on v6e/v7x).
    onehot = (idx == b_iota).astype(noise_ref.dtype)                # (tr, B_pad)

    # Exact row gather of the small noise table: one-hot matmul on the MXU,
    # accumulating in f32 (at most one nonzero term per row -> exact).
    gathered = jnp.dot(onehot, noise_ref[...],
                       preferred_element_type=jnp.float32)          # (tr, F)

    x = x_ref[...]
    o_ref[...] = (x * gathered.astype(x.dtype)).astype(o_ref.dtype)


def feature_dropout_pallas(x, batch_idxs, noise, *, target_tile_bytes=4 << 20):
    """Training-path kernel: out[i] = x[i] * noise[batch_idxs[i]].

    x: (L, F) float; batch_idxs: (L,) int; noise: (B, F) float, already scaled
    by 1/(1-p).
    """
    L, F = x.shape
    B = noise.shape[0]

    itemsize = x.dtype.itemsize
    row_align = 8 * max(1, 4 // itemsize)      # 8 f32, 16 bf16, 32 for 8-bit
    F_lanes = _round_up(F, 128)                # physical VMEM lane footprint
    B_pad = _round_up(max(B, 8), 8)            # sublane-aligned noise rows

    # Row-tile size: aim for ~target_tile_bytes per x tile (keeps this HBM-
    # bandwidth-bound kernel near the roofline); never larger than the input.
    tr = max(row_align,
             _round_up(max(target_tile_bytes // max(F_lanes * itemsize, 1), 1),
                       row_align))
    tr = min(tr, _round_up(L, row_align))
    # Force a >= num_cores-way split only on multi-TensorCore chips (v7x).
    cores = _tensorcores_per_chip()
    if cores > 1:
        tr = min(tr, max(row_align, _round_up(_cdiv(L, cores), row_align)))

    noise_itemsize = itemsize                  # noise is cast to x.dtype below

    def vmem_needed(tile_rows, noise_buffers):
        x_tile = tile_rows * F_lanes * itemsize              # per buffer
        idx_tile = tile_rows * 128 * 4                       # (tr,1) int32 lane-pads to 128
        noise_block = B_pad * F_lanes * noise_itemsize
        # In-kernel intermediates: one-hot (lane-padded), f32 gather, mul temp.
        scratch = (tile_rows * _round_up(B_pad, 128) * itemsize
                   + tile_rows * F_lanes * 4
                   + tile_rows * F_lanes * itemsize)
        return (2 * (2 * x_tile + idx_tile)                  # x + out + idx, double-buffered
                + noise_buffers * noise_block + scratch)

    vmem_cap = _vmem_capacity_bytes()
    vmem_budget = max(int(vmem_cap * 3 // 4), 16 << 20)      # ~48 MiB v7x, ~96 MiB v5e/v6e
    while tr > row_align and vmem_needed(tr, 2) > vmem_budget:
        tr = max(row_align, _round_up(tr // 2, row_align))

    num_tiles = _cdiv(L, tr)
    vmem_limit = int(max(16 << 20, min(vmem_needed(tr, 2) + (4 << 20), vmem_cap)))

    # Only the tiny (B, F) noise table gets a wrapper-side copy (row padding +
    # dtype cast); x itself is fed to the kernel unpadded.
    idx_2d = batch_idxs.astype(jnp.int32).reshape(L, 1)
    noise_p = noise.astype(x.dtype)
    if B_pad != B:
        noise_p = jnp.pad(noise_p, ((0, B_pad - B), (0, 0)))

    cost = pl.CostEstimate(
        flops=2 * L * B_pad * F + L * F,
        transcendentals=0,
        bytes_accessed=2 * L * F * itemsize + L * 4 + B_pad * F * noise_itemsize,
    )

    x_spec = pl.BlockSpec((tr, F), lambda i: (i, 0))
    idx_spec = pl.BlockSpec((tr, 1), lambda i: (i, 0))
    out_spec = pl.BlockSpec((tr, F), lambda i: (i, 0))

    def launch(noise_spec):
        return pl.pallas_call(
            _feature_dropout_kernel,
            out_shape=jax.ShapeDtypeStruct((L, F), x.dtype),
            grid_spec=pltpu.PrefetchScalarGridSpec(
                num_scalar_prefetch=0,
                grid=(num_tiles,),
                in_specs=[x_spec, idx_spec, noise_spec],
                out_specs=out_spec,
            ),
            compiler_params=pltpu.CompilerParams(
                dimension_semantics=("parallel",),
                vmem_limit_bytes=vmem_limit,
            ),
            cost_estimate=cost,
        )(x, idx_2d, noise_p)

    # Constant-index noise table: request a single VMEM buffer (it is never
    # re-fetched); fall back to the default double-buffered spec if this jax
    # version rejects Buffered(1).
    try:
        return launch(pl.BlockSpec((B_pad, F), lambda i: (0, 0),
                                   pipeline_mode=pl.Buffered(1)))
    except Exception:
        return launch(pl.BlockSpec((B_pad, F), lambda i: (0, 0)))


def make_feature_dropout_noise(key, batch_size, num_features, p):
    """ctx.noise of the PyTorch function (before the per-row gather), 0 < p < 1."""
    keep = jax.random.bernoulli(key, 1.0 - p, (batch_size, num_features))
    return keep.astype(jnp.float32) / (1.0 - p)


def feature_dropout(x, batch_idxs, batch_size, *, p=0.5, train=False, key=None):
    """Forward of FeatureDropout. Short-circuits eval / p==0 / p==1 (no kernel)."""
    if p < 0.0 or p > 1.0:
        raise ValueError(
            "dropout probability has to be between 0 and 1, but got {}".format(p))
    if (not train) or p == 0.0:
        return x                          # identity: skip the HBM pass entirely
    if p == 1.0:
        return jnp.zeros_like(x)
    noise = make_feature_dropout_noise(key, batch_size, x.shape[1], p)
    return feature_dropout_pallas(x, batch_idxs, noise)


if __name__ == "__main__":
    key = jax.random.PRNGKey(0)
    k_x, k_noise, k_x2, k_noise2 = jax.random.split(key, 4)

    # 3 batch elements (sentences) of lengths 20/15/10 concatenated -> L = 45
    # rows (exercises the ragged tail block: no wrapper pad, masked tail store).
    seg_lens = (20, 15, 10)
    B = len(seg_lens)
    L = sum(seg_lens)
    F = 128
    p = 0.5

    x = jax.random.normal(k_x, (L, F), dtype=jnp.float32)
    batch_idxs = jnp.concatenate(
        [jnp.full((n,), b, jnp.int32) for b, n in enumerate(seg_lens)])

    # Training path with explicit noise so we can check against a pure-JAX ref.
    noise = make_feature_dropout_noise(k_noise, B, F, p)
    out = jax.block_until_ready(feature_dropout_pallas(x, batch_idxs, noise))
    ref = x * noise[batch_idxs, :]
    assert out.shape == (L, F)
    assert jnp.allclose(out, ref, atol=1e-6, rtol=1e-6), "train path mismatch"

    # Ragged feature dim (F not a multiple of 128): block last dim == full F,
    # no wrapper padding, masked store on the final lane group.
    F2 = 100
    x2 = jax.random.normal(k_x2, (L, F2), dtype=jnp.float32)
    noise2 = make_feature_dropout_noise(k_noise2, B, F2, p)
    out2 = jax.block_until_ready(feature_dropout_pallas(x2, batch_idxs, noise2))
    ref2 = x2 * noise2[batch_idxs, :]
    assert jnp.allclose(out2, ref2, atol=1e-6, rtol=1e-6), "ragged-F mismatch"

    # Module-style wrapper: eval path (identity, no kernel launch) and p == 1.
    out_eval = jax.block_until_ready(
        feature_dropout(x, batch_idxs, B, p=p, train=False, key=k_noise))
    assert jnp.allclose(out_eval, x), "eval path mismatch"

    out_p1 = jax.block_until_ready(
        feature_dropout(x, batch_idxs, B, p=1.0, train=True, key=k_noise))
    assert jnp.allclose(out_p1, jnp.zeros_like(x)), "p==1 path mismatch"

    print("KERNEL_OK")
</pallas_src>

<mosaic_0001>
module attributes {stable_mosaic.version = 11 : i64} {
  func.func @_feature_dropout_kernel(%arg0: i32, %arg1: memref<48x128xf32, #tpu.memory_space<vmem>>, %arg2: memref<48x1xi32, #tpu.memory_space<vmem>>, %arg3: memref<8x128xf32, #tpu.memory_space<vmem>>, %arg4: memref<48x128xf32, #tpu.memory_space<vmem>>) attributes {dimension_semantics = [#tpu.dimension_semantics<parallel>], iteration_bounds = array<i64: 1>, scalar_prefetch = 0 : i64, scratch_operands = 0 : i64, tpu.core_type = #tpu.core_type<tc>, window_params = [{transform_indices = @transform_0, window_bounds = array<i64: 48, 128>}, {transform_indices = @transform_1, window_bounds = array<i64: 48, 1>}, {pipeline_mode = #tpu.pipeline_mode<synchronous>, transform_indices = @transform_2, window_bounds = array<i64: 8, 128>}, {transform_indices = @transform_3, window_bounds = array<i64: 48, 128>}]} {
    %c0 = arith.constant 0 : index
    %c0_0 = arith.constant 0 : index
    %0 = vector.load %arg2[%c0, %c0_0] : memref<48x1xi32, #tpu.memory_space<vmem>>, vector<48x1xi32>
    %1 = tpu.iota {dimensions = array<i32: 1>} : vector<48x8xi32>
    %2 = vector.broadcast %0 : vector<48x1xi32> to vector<48x8xi32>
    %3 = arith.cmpi eq, %2, %1 : vector<48x8xi32>
    %4 = arith.extui %3 : vector<48x8xi1> to vector<48x8xi32>
    %5 = arith.sitofp %4 : vector<48x8xi32> to vector<48x8xf32>
    %c0_1 = arith.constant 0 : index
    %c0_2 = arith.constant 0 : index
    %6 = vector.load %arg3[%c0_1, %c0_2] : memref<8x128xf32, #tpu.memory_space<vmem>>, vector<8x128xf32>
    %cst = arith.constant dense<0.000000e+00> : vector<48x128xf32>
    %7 = tpu.matmul %5, %6, %cst {dimension_numbers = #tpu.dot_dimension_numbers<[1], [0], [0], [1], [0, 0, 1, 1], [], []>} : vector<48x8xf32>, vector<8x128xf32>, vector<48x128xf32> -> vector<48x128xf32>
    %c0_3 = arith.constant 0 : index
    %c0_4 = arith.constant 0 : index
    %8 = vector.load %arg1[%c0_3, %c0_4] : memref<48x128xf32, #tpu.memory_space<vmem>>, vector<48x128xf32>
    %9 = arith.mulf %8, %7 : vector<48x128xf32>
    %c0_5 = arith.constant 0 : index
    %c0_6 = arith.constant 0 : index
    %10 = vector.load %arg4[%c0_5, %c0_6] : memref<48x128xf32, #tpu.memory_space<vmem>>, vector<48x128xf32>
    tpu.vector_store %arg4[%c0_5, %c0_6], %9 {strides = array<i32>} : memref<48x128xf32, #tpu.memory_space<vmem>>, vector<48x128xf32>,
    return
  }
  func.func @transform_0(%arg0: i32) -> (i32, i32) {
    %c0_i32 = arith.constant 0 : i32
    %c0_i32_0 = arith.constant 0 : i32
    return %arg0, %c0_i32 : i32, i32
  }
  func.func @transform_1(%arg0: i32) -> (i32, i32) {
    %c0_i32 = arith.constant 0 : i32
    %c0_i32_0 = arith.constant 0 : i32
    return %arg0, %c0_i32 : i32, i32
  }
  func.func @transform_2(%arg0: i32) -> (i32, i32) {
    %c0_i32 = arith.constant 0 : i32
    %c0_i32_0 = arith.constant 0 : i32
    %c0_i32_1 = arith.constant 0 : i32
    return %c0_i32, %c0_i32_0 : i32, i32
  }
  func.func @transform_3(%arg0: i32) -> (i32, i32) {
    %c0_i32 = arith.constant 0 : i32
    %c0_i32_0 = arith.constant 0 : i32
    return %arg0, %c0_i32 : i32, i32
  }
}

module attributes {stable_mosaic.version = 11 : i64} {
  func.func @_feature_dropout_kernel(%arg0: i32, %arg1: memref<48x128xf32, #tpu.memory_space<vmem>>, %arg2: memref<48x1xi32, #tpu.memory_space<vmem>>, %arg3: memref<8x128xf32, #tpu.memory_space<vmem>>, %arg4: memref<48x128xf32, #tpu.memory_space<vmem>>) attributes {dimension_semantics = [#tpu.dimension_semantics<parallel>], iteration_bounds = array<i64: 1>, scalar_prefetch = 0 : i64, scratch_operands = 0 : i64, tpu.core_type = #tpu.core_type<tc>, window_params = [{transform_indices = @transform_0, window_bounds = array<i64: 48, 128>}, {transform_indices = @transform_1, window_bounds = array<i64: 48, 1>}, {pipeline_mode = #tpu.pipeline_mode<synchronous>, transform_indices = @transform_2, window_bounds = array<i64: 8, 128>}, {transform_indices = @transform_3, window_bounds = array<i64: 48, 128>}]} {
    %c0 = arith.constant 0 : index
    %c0_0 = arith.constant 0 : index
    %0 = vector.load %arg2[%c0, %c0_0] : memref<48x1xi32, #tpu.memory_space<vmem>>, vector<48x1xi32>
    %1 = tpu.iota {dimensions = array<i32: 1>} : vector<48x8xi32>
    %2 = vector.broadcast %0 : vector<48x1xi32> to vector<48x8xi32>
    %3 = arith.cmpi eq, %2, %1 : vector<48x8xi32>
    %4 = arith.extui %3 : vector<48x8xi1> to vector<48x8xi32>
    %5 = arith.sitofp %4 : vector<48x8xi32> to vector<48x8xf32>
    %c0_1 = arith.constant 0 : index
    %c0_2 = arith.constant 0 : index
    %6 = vector.load %arg3[%c0_1, %c0_2] : memref<8x128xf32, #tpu.memory_space<vmem>>, vector<8x128xf32>
    %cst = arith.constant dense<0.000000e+00> : vector<48x128xf32>
    %7 = tpu.matmul %5, %6, %cst {dimension_numbers = #tpu.dot_dimension_numbers<[1], [0], [0], [1], [0, 0, 1, 1], [], []>} : vector<48x8xf32>, vector<8x128xf32>, vector<48x128xf32> -> vector<48x128xf32>
    %c0_3 = arith.constant 0 : index
    %c0_4 = arith.constant 0 : index
    %8 = vector.load %arg1[%c0_3, %c0_4] : memref<48x128xf32, #tpu.memory_space<vmem>>, vector<48x128xf32>
    %9 = arith.mulf %8, %7 : vector<48x128xf32>
    %c0_5 = arith.constant 0 : index
    %c0_6 = arith.constant 0 : index
    %10 = vector.load %arg4[%c0_5, %c0_6] : memref<48x128xf32, #tpu.memory_space<vmem>>, vector<48x128xf32>
    tpu.vector_store %arg4[%c0_5, %c0_6], %9 {strides = array<i32>} : memref<48x128xf32, #tpu.memory_space<vmem>>, vector<48x128xf32>,
    return
  }
  func.func @transform_0(%arg0: i32) -> (i32, i32) {
    %c0_i32 = arith.constant 0 : i32
    %c0_i32_0 = arith.constant 0 : i32
    return %arg0, %c0_i32 : i32, i32
  }
  func.func @transform_1(%arg0: i32) -> (i32, i32) {
    %c0_i32 = arith.constant 0 : i32
    %c0_i32_0 = arith.constant 0 : i32
    return %arg0, %c0_i32 : i32, i32
  }
  func.func @transform_2(%arg0: i32) -> (i32, i32) {
    %c0_i32 = arith.constant 0 : i32
    %c0_i32_0 = arith.constant 0 : i32
    %c0_i32_1 = arith.constant 0 : i32
    return %c0_i32, %c0_i32_0 : i32, i32
  }
  func.func @transform_3(%arg0: i32) -> (i32, i32) {
    %c0_i32 = arith.constant 0 : i32
    %c0_i32_0 = arith.constant 0 : i32
    return %arg0, %c0_i32 : i32, i32
  }
}

</mosaic_0001>

<bundles_post_ra>
// kernel: tpu_custom_call.1
= control target key start
LH: loop header
LB: loop body
LE: loop exit
PB: predicated region body
PF: predicated region fallthrough
CT: control target
= control target key end

     0   :  { %8 = vsyncpa [#allocation3], 0  ;;  %s379_s0 = inlined_call_operand.vmem [shape: f32[45,128], index: 0, kind: input, shape index: {}]   ;;  %s380_s1 = inlined_call_operand.vmem [shape: s32[45,1], index: 1, kind: input, shape index: {}]   ;;  %s381_s2 = inlined_call_operand.hbm [shape: f32[8,128], index: 2, kind: input, shape index: {}]   ;;  %s382_s3 = inlined_call_operand.hbm [shape: f32[45,128], index: 3, kind: output, shape index: {}]  }
   0x1   :  { %9 = vsyncpa [#allocation4], 0  ;;  %s305_s12 = smov [#allocation2]  }
   0x2   :  { %s20_s13 = sshll.u32 %s305_s12, 4  ;;  %s21_s13 = int_to_ptr.vmem [resolvable:$true] %s20_s13 }
   0x3   :  { %s269_s14 = scalar_lea.vmem %s21_s13, 128  ;;  %p274_p1 = scmp.lt.s32.totalorder %s21_s13, %s21_s13 }
   0x4   :  { %p270_p0 = scmp.ne.s32.totalorder %s21_s13, %s269_s14  ;;  %p275_p2 = scmp.lt.s32.totalorder %s269_s14, %s269_s14 }
   0x6   :  { %p276_p3 = por %p275_p2, %p274_p1 }
   0x8   :  { %p277_p4 = pnand %p276_p3, %p270_p0 }
   0xa   :  { %280 = shalt.err (!%p277_p4)
}
   0xb   :  { %23 = dma.hbm_to_vmem [thread:$0]  %s381_s2, 128, %s21_s13, [#allocation3]  }
   0xc   :  { %301 = dma.done.wait [#allocation3], 128  }
   0xd   :  { %302 = vsyncadd [#allocation3], 4294967168  ;;  %v306_v0 = vmov 0   ;;  %v29_v1 = vld [vmem:[%s380_s1 + $0x10] sm:$0xff]  ;;  %v27_v2 = vld [vmem:[%s380_s1] sm:$0xff]  ;;  %v33_v8 = vlaneseq  ;;  %vm72_vm0 = vcmask 64512  }
   0xe   :  { %260 = vset.pattern.permute.xlu1 %v306_v0  ;;  %259 = vset.pattern.permute.xlu0 %v306_v0  ;;  %v30_v3 = vld [vmem:[%s380_s1 + $0x18] sm:$0xff]  ;;  %v31_v4 = vld [vmem:[%s380_s1 + $0x20] sm:$0xff]  ;;  %v28_v6 = vld [vmem:[%s380_s1 + $0x8] sm:$0xff]  ;;  %v307_v12 = vmov 0.0   ;;  %s308_s8 = smov [#allocation5]  }
   0xf   :  { %42 = vperm.xlu0 %259, %v29_v1   ;;  %36 = vperm.xlu1 %260, %v27_v2   ;;  %v71_v5 = vld [vmem:[#allocation2] sm:$0xff]  ;;  %v32_v7 = vld [vmem:[%s380_s1 + $0x28] sm:$0xff]  ;;  %v34_v9 = vand.u32 127, %v33_v8  ;;  %v189_v23 = vld [vmem:[%s379_s0 + $0x18] sm:$0xff]  ;;  %s209_s9 = sshll.u32 %s308_s8, 4  ;;  %s210_s9 = int_to_ptr.vmem [resolvable:$true] %s209_s9 }
  0x10   :  { %251 = vmatprep.subr.mxu1 %v71_v5  ;;  %240 = vmatprep.subr.mxu0 %v71_v5  ;;  %v188_v25 = vld [vmem:[%s379_s0 + $0x10] sm:$0xff]  ;;  %v187_v28 = vld [vmem:[%s379_s0 + $0x8] sm:$0xff]  ;;  %v186_v33 = vld [vmem:[%s379_s0] sm:$0xff]  ;;  %s281_s14 = scalar_lea.vmem %s210_s9, 768  ;;  %p286_p6 = scmp.lt.s32.totalorder %s210_s9, %s210_s9 }
  0x11   :  { %252 = vmatpush3.msra.mxu1 %v71_v5  ;;  %241 = vmatpush3.msra.mxu0 %v71_v5  ;;  %v191_v29 = vld [vmem:[%s379_s0 + $0x28] sm:$0xff]  ;;  %v190_v34 = vld [vmem:[%s379_s0 + $0x20] sm:$0xff]  ;;  %p282_p5 = scmp.ne.s32.totalorder %s210_s9, %s281_s14  ;;  %p287_p7 = scmp.lt.s32.totalorder %s281_s14, %s281_s14 }
  0x13   :  { %45 = vperm.xlu0 %259, %v30_v3   ;;  %48 = vperm.xlu1 %260, %v31_v4   ;;  %p288_p8 = por %p287_p7, %p286_p6 }
  0x15   :  { %p289_p9 = pnand %p288_p8, %p282_p5 }
  0x17   :  { %39 = vperm.xlu0 %259, %v28_v6   ;;  %51 = vperm.xlu1 %260, %v32_v7  }
  0x8a   :  { %v43_v10 = vpop.permute.xlu0 %42  ;;  %v37_v11 = vpop.permute.xlu1 %36 }
  0x8b   :  { %vm55_vm1 = vcmp.eq.s32.totalorder %v43_v10, %v34_v9  ;;  %vm53_vm2 = vcmp.eq.s32.totalorder %v37_v11, %v34_v9 }
  0x8c   :  { %v221_v13 = vsel %vm53_vm2, 1.0, %v307_v12  ;;  %v223_v14 = vsel %vm55_vm1, 1.0, %v307_v12 }
  0x8d   :  { %242 = vmatprep.mubr.msk.f32.mxu0 %vm72_vm0, %v221_v13  ;;  %245 = vmatprep.mubr.msk.f32.mxu1 %vm72_vm0, %v223_v14 }
  0x8e   :  { %v46_v15 = vpop.permute.xlu0 %45  ;;  %v49_v16 = vpop.permute.xlu1 %48 }
  0x8f   :  { %vm56_vm3 = vcmp.eq.s32.totalorder %v46_v15, %v34_v9  ;;  %vm57_vm4 = vcmp.eq.s32.totalorder %v49_v16, %v34_v9 }
  0x90   :  { %v224_v17 = vsel %vm56_vm3, 1.0, %v307_v12  ;;  %v225_v18 = vsel %vm57_vm4, 1.0, %v307_v12 }
  0x91   :  { %246 = vmatmul.mubr.msk.f32.vlgmr.msra.gmra.mxu1 %vm72_vm0, %v224_v17 }
  0x92   :  { %v40_v19 = vpop.permute.xlu0 %39  ;;  %248 = vmatprep.mubr.msk.f32.mxu1 %vm72_vm0, %v225_v18  ;;  %v52_v20 = vpop.permute.xlu1 %51 }
  0x93   :  { %vm54_vm5 = vcmp.eq.s32.totalorder %v40_v19, %v34_v9  ;;  %vm58_vm6 = vcmp.eq.s32.totalorder %v52_v20, %v34_v9 }
  0x94   :  { %v222_v21 = vsel %vm54_vm5, 1.0, %v307_v12  ;;  %v226_v22 = vsel %vm58_vm6, 1.0, %v307_v12 }
  0x95   :  { %243 = vmatmul.mubr.msk.f32.vlgmr.msra.gmra.mxu0 %vm72_vm0, %v222_v21  ;;  %249 = vmatmul.mubr.msk.f32.gmra.mxu1 %vm72_vm0, %v226_v22 }
 0x151   :  { %v247_v24 = vpop.f32.mrf.mxu1 }
 0x152   :  { %v195_v26 = vmul.f32 %v247_v24, %v189_v23 }
 0x153   :  { %v167_v27 = vpop.f32.mrf.mxu1 }
 0x154   :  { %201 = vst [vmem:[#allocation5 + $0x18] sm:$0xff] %v195_v26  ;;  %v194_v30 = vmul.f32 %v188_v25, %v167_v27 }
 0x155   :  { %v244_v31 = vpop.f32.mrf.mxu0  ;;  %v250_v32 = vpop.f32.mrf.mxu1 }
 0x156   :  { %200 = vst [vmem:[#allocation5 + $0x10] sm:$0xff] %v194_v30  ;;  %v193_v35 = vmul.f32 %v244_v31, %v187_v28  ;;  %v197_v36 = vmul.f32 %v250_v32, %v191_v29 }
 0x157   :  { %v157_v37 = vpop.f32.mrf.mxu0  ;;  %v177_v38 = vpop.f32.mrf.mxu1 }
 0x158   :  { %199 = vst [vmem:[#allocation5 + $0x8] sm:$0xff] %v193_v35  ;;  %203 = vst [vmem:[#allocation5 + $0x28] sm:$0xff] %v197_v36  ;;  %v192_v39 = vmul.f32 %v186_v33, %v157_v37  ;;  %v196_v40 = vmul.f32 %v190_v34, %v177_v38 }
 0x15a   :  { %198 = vst [vmem:[#allocation5] sm:$0xff] %v192_v39  ;;  %202 = vst [vmem:[#allocation5 + $0x20] sm:$0xff] %v196_v40 }
 0x15b   :  { %292 = shalt.err (!%p289_p9)
}
 0x15c   :  { %s309_s0 = smov 128   ;;  %s310_s15 = smov 8  }
 0x15d   :  { %215 = dma.vmem_to_hbm [thread:$0]  %s210_s9, 768, %s382_s3, [#allocation4], %s309_s0, %s309_s0, %s310_s15  }
 0x15e   :  { %303 = dma.done.wait [#allocation4], 768  }
 0x15f   :  { %304 = vsyncadd [#allocation4], 4294966528 }
 0x160   :  { %219 = vsyncpa [#allocation3], 1 }
 0x161   :  { %220 = vsyncpa [#allocation4], 1 }

// kernel: tpu_custom_call.1
= control target key start
LH: loop header
LB: loop body
LE: loop exit
PB: predicated region body
PF: predicated region fallthrough
CT: control target
= control target key end

     0   :  { %8 = vsyncpa [#allocation3], 0  ;;  %s379_s0 = inlined_call_operand.vmem [shape: f32[45,128], index: 0, kind: input, shape index: {}]   ;;  %s380_s1 = inlined_call_operand.vmem [shape: s32[45,1], index: 1, kind: input, shape index: {}]   ;;  %s381_s2 = inlined_call_operand.hbm [shape: f32[8,128], index: 2, kind: input, shape index: {}]   ;;  %s382_s3 = inlined_call_operand.hbm [shape: f32[45,128], index: 3, kind: output, shape index: {}]  }
   0x1   :  { %9 = vsyncpa [#allocation4], 0  ;;  %s305_s12 = smov [#allocation2]  }
   0x2   :  { %s20_s13 = sshll.u32 %s305_s12, 4  ;;  %s21_s13 = int_to_ptr.vmem [resolvable:$true] %s20_s13 }
   0x3   :  { %s269_s14 = scalar_lea.vmem %s21_s13, 128  ;;  %p274_p1 = scmp.lt.s32.totalorder %s21_s13, %s21_s13 }
   0x4   :  { %p270_p0 = scmp.ne.s32.totalorder %s21_s13, %s269_s14  ;;  %p275_p2 = scmp.lt.s32.totalorder %s269_s14, %s269_s14 }
   0x6   :  { %p276_p3 = por %p275_p2, %p274_p1 }
   0x8   :  { %p277_p4 = pnand %p276_p3, %p270_p0 }
   0xa   :  { %280 = shalt.err (!%p277_p4)
}
   0xb   :  { %23 = dma.hbm_to_vmem [thread:$0]  %s381_s2, 128, %s21_s13, [#allocation3]  }
   0xc   :  { %301 = dma.done.wait [#allocation3], 128  }
   0xd   :  { %302 = vsyncadd [#allocation3], 4294967168  ;;  %v306_v0 = vmov 0   ;;  %v29_v1 = vld [vmem:[%s380_s1 + $0x10] sm:$0xff]  ;;  %v27_v2 = vld [vmem:[%s380_s1] sm:$0xff]  ;;  %v33_v8 = vlaneseq  ;;  %vm72_vm0 = vcmask 64512  }
   0xe   :  { %260 = vset.pattern.permute.xlu1 %v306_v0  ;;  %259 = vset.pattern.permute.xlu0 %v306_v0  ;;  %v30_v3 = vld [vmem:[%s380_s1 + $0x18] sm:$0xff]  ;;  %v31_v4 = vld [vmem:[%s380_s1 + $0x20] sm:$0xff]  ;;  %v28_v6 = vld [vmem:[%s380_s1 + $0x8] sm:$0xff]  ;;  %v307_v12 = vmov 0.0   ;;  %s308_s8 = smov [#allocation5]  }
   0xf   :  { %42 = vperm.xlu0 %259, %v29_v1   ;;  %36 = vperm.xlu1 %260, %v27_v2   ;;  %v71_v5 = vld [vmem:[#allocation2] sm:$0xff]  ;;  %v32_v7 = vld [vmem:[%s380_s1 + $0x28] sm:$0xff]  ;;  %v34_v9 = vand.u32 127, %v33_v8  ;;  %v189_v23 = vld [vmem:[%s379_s0 + $0x18] sm:$0xff]  ;;  %s209_s9 = sshll.u32 %s308_s8, 4  ;;  %s210_s9 = int_to_ptr.vmem [resolvable:$true] %s209_s9 }
  0x10   :  { %251 = vmatprep.subr.mxu1 %v71_v5  ;;  %240 = vmatprep.subr.mxu0 %v71_v5  ;;  %v188_v25 = vld [vmem:[%s379_s0 + $0x10] sm:$0xff]  ;;  %v187_v28 = vld [vmem:[%s379_s0 + $0x8] sm:$0xff]  ;;  %v186_v33 = vld [vmem:[%s379_s0] sm:$0xff]  ;;  %s281_s14 = scalar_lea.vmem %s210_s9, 768  ;;  %p286_p6 = scmp.lt.s32.totalorder %s210_s9, %s210_s9 }
  0x11   :  { %252 = vmatpush3.msra.mxu1 %v71_v5  ;;  %241 = vmatpush3.msra.mxu0 %v71_v5  ;;  %v191_v29 = vld [vmem:[%s379_s0 + $0x28] sm:$0xff]  ;;  %v190_v34 = vld [vmem:[%s379_s0 + $0x20] sm:$0xff]  ;;  %p282_p5 = scmp.ne.s32.totalorder %s210_s9, %s281_s14  ;;  %p287_p7 = scmp.lt.s32.totalorder %s281_s14, %s281_s14 }
  0x13   :  { %45 = vperm.xlu0 %259, %v30_v3   ;;  %48 = vperm.xlu1 %260, %v31_v4   ;;  %p288_p8 = por %p287_p7, %p286_p6 }
  0x15   :  { %p289_p9 = pnand %p288_p8, %p282_p5 }
  0x17   :  { %39 = vperm.xlu0 %259, %v28_v6   ;;  %51 = vperm.xlu1 %260, %v32_v7  }
  0x8a   :  { %v43_v10 = vpop.permute.xlu0 %42  ;;  %v37_v11 = vpop.permute.xlu1 %36 }
  0x8b   :  { %vm55_vm1 = vcmp.eq.s32.totalorder %v43_v10, %v34_v9  ;;  %vm53_vm2 = vcmp.eq.s32.totalorder %v37_v11, %v34_v9 }
  0x8c   :  { %v221_v13 = vsel %vm53_vm2, 1.0, %v307_v12  ;;  %v223_v14 = vsel %vm55_vm1, 1.0, %v307_v12 }
  0x8d   :  { %242 = vmatprep.mubr.msk.f32.mxu0 %vm72_vm0, %v221_v13  ;;  %245 = vmatprep.mubr.msk.f32.mxu1 %vm72_vm0, %v223_v14 }
  0x8e   :  { %v46_v15 = vpop.permute.xlu0 %45  ;;  %v49_v16 = vpop.permute.xlu1 %48 }
  0x8f   :  { %vm56_vm3 = vcmp.eq.s32.totalorder %v46_v15, %v34_v9  ;;  %vm57_vm4 = vcmp.eq.s32.totalorder %v49_v16, %v34_v9 }
  0x90   :  { %v224_v17 = vsel %vm56_vm3, 1.0, %v307_v12  ;;  %v225_v18 = vsel %vm57_vm4, 1.0, %v307_v12 }
  0x91   :  { %246 = vmatmul.mubr.msk.f32.vlgmr.msra.gmra.mxu1 %vm72_vm0, %v224_v17 }
  0x92   :  { %v40_v19 = vpop.permute.xlu0 %39  ;;  %248 = vmatprep.mubr.msk.f32.mxu1 %vm72_vm0, %v225_v18  ;;  %v52_v20 = vpop.permute.xlu1 %51 }
  0x93   :  { %vm54_vm5 = vcmp.eq.s32.totalorder %v40_v19, %v34_v9  ;;  %vm58_vm6 = vcmp.eq.s32.totalorder %v52_v20, %v34_v9 }
  0x94   :  { %v222_v21 = vsel %vm54_vm5, 1.0, %v307_v12  ;;  %v226_v22 = vsel %vm58_vm6, 1.0, %v307_v12 }
  0x95   :  { %243 = vmatmul.mubr.msk.f32.vlgmr.msra.gmra.mxu0 %vm72_vm0, %v222_v21  ;;  %249 = vmatmul.mubr.msk.f32.gmra.mxu1 %vm72_vm0, %v226_v22 }
 0x151   :  { %v247_v24 = vpop.f32.mrf.mxu1 }
 0x152   :  { %v195_v26 = vmul.f32 %v247_v24, %v189_v23 }
 0x153   :  { %v167_v27 = vpop.f32.mrf.mxu1 }
 0x154   :  { %201 = vst [vmem:[#allocation5 + $0x18] sm:$0xff] %v195_v26  ;;  %v194_v30 = vmul.f32 %v188_v25, %v167_v27 }
 0x155   :  { %v244_v31 = vpop.f32.mrf.mxu0  ;;  %v250_v32 = vpop.f32.mrf.mxu1 }
 0x156   :  { %200 = vst [vmem:[#allocation5 + $0x10] sm:$0xff] %v194_v30  ;;  %v193_v35 = vmul.f32 %v244_v31, %v187_v28  ;;  %v197_v36 = vmul.f32 %v250_v32, %v191_v29 }
 0x157   :  { %v157_v37 = vpop.f32.mrf.mxu0  ;;  %v177_v38 = vpop.f32.mrf.mxu1 }
 0x158   :  { %199 = vst [vmem:[#allocation5 + $0x8] sm:$0xff] %v193_v35  ;;  %203 = vst [vmem:[#allocation5 + $0x28] sm:$0xff] %v197_v36  ;;  %v192_v39 = vmul.f32 %v186_v33, %v157_v37  ;;  %v196_v40 = vmul.f32 %v190_v34, %v177_v38 }
 0x15a   :  { %198 = vst [vmem:[#allocation5] sm:$0xff] %v192_v39  ;;  %202 = vst [vmem:[#allocation5 + $0x20] sm:$0xff] %v196_v40 }
 0x15b   :  { %292 = shalt.err (!%p289_p9)
}
 0x15c   :  { %s309_s0 = smov 128   ;;  %s310_s15 = smov 8  }
 0x15d   :  { %215 = dma.vmem_to_hbm [thread:$0]  %s210_s9, 768, %s382_s3, [#allocation4], %s309_s0, %s309_s0, %s310_s15  }
 0x15e   :  { %303 = dma.done.wait [#allocation4], 768  }
 0x15f   :  { %304 = vsyncadd [#allocation4], 4294966528 }
 0x160   :  { %219 = vsyncpa [#allocation3], 1 }
 0x161   :  { %220 = vsyncpa [#allocation4], 1 }

</bundles_post_ra>
